<compile_context>
chip_gen: v7x
topology: tpu7x:2x2x1
jax: 0.10.0
libtpu: 0.0.40
codegen_flags: <defaults>
</compile_context>

<pallas_src>
import jax
import jax.numpy as jnp
from jax import lax
from jax.experimental import pallas as pl
from jax.experimental.pallas import tpu as pltpu

LANES = 128       # vreg lane width
ACC_ROWS = 64     # accumulator / chunk sublane depth; multiple of 8/16/32
                  # so it satisfies f32 / bf16 / int8-fp8 sublane packing.


def _default_num_splits():
    """2 on v7x (two TensorCores share a chip's HBM), else 1."""
    try:
        kind = jax.devices()[0].device_kind.lower()
    except Exception:
        return 1
    return 2 if "v7" in kind else 1


def _make_kernel(*, rows, tile_rows, bps, num_splits):
    """Build the kernel for a fixed (static) tiling.

    rows       : true number of 128-lane rows (pre-rounding to tile_rows)
    tile_rows  : rows per grid block (multiple of ACC_ROWS)
    bps        : blocks per split (inner / "arbitrary" grid extent)
    num_splits : outer / "parallel" grid extent
    """
    n_chunks = tile_rows // ACC_ROWS
    full_blocks = rows // tile_rows                     # blocks with no OOB rows
    any_masked = (num_splits * bps * tile_rows) != rows  # static
    unroll = max(1, min(4, n_chunks))

    def kernel(pred_ref, gt_ref, sse_ref, pos_ref):
        c = pl.program_id(0)   # split (TensorCore) index
        s = pl.program_id(1)   # step within split

        @pl.when(s == 0)
        def _():
            # Per-split partial outputs are resident across the "arbitrary"
            # axis (same block index for every s) -> use them as accumulators.
            sse_ref[...] = jnp.zeros_like(sse_ref)
            pos_ref[...] = jnp.zeros_like(pos_ref)

        def accumulate(apply_mask):
            b = c * bps + s                 # nominal global block index
            limit = rows - b * tile_rows    # valid rows in this block (<=0 ok)
            row_iota = (lax.broadcasted_iota(jnp.int32, (ACC_ROWS, LANES), 0)
                        if apply_mask else None)

            def chunk(ci, carry):
                sse_p, pos_p = carry
                r0 = pl.multiple_of(ci * ACC_ROWS, ACC_ROWS)
                # Native-dtype loads, cast to f32 in-register.
                p = pred_ref[pl.ds(r0, ACC_ROWS), :].astype(jnp.float32)
                g = gt_ref[pl.ds(r0, ACC_ROWS), :].astype(jnp.float32)
                d = p - g
                sq = d * d
                pos = (g == 1.0).astype(jnp.float32)
                if apply_mask:
                    m = row_iota < (limit - ci * ACC_ROWS)
                    sq = jnp.where(m, sq, 0.0)
                    pos = jnp.where(m, pos, 0.0)
                return sse_p + sq, pos_p + pos

            init = (jnp.zeros((ACC_ROWS, LANES), jnp.float32),
                    jnp.zeros((ACC_ROWS, LANES), jnp.float32))
            # Register-carried partials; the VMEM accumulator is touched once
            # per block, so the vst slot stays quiet.
            sse_p, pos_p = lax.fori_loop(0, n_chunks, chunk, init,
                                         unroll=unroll)
            sse_ref[0] += sse_p
            pos_ref[0] += pos_p

        if any_masked:
            # Keep the hot path free of masking ops; only tail/overflow blocks
            # pay for the iota + selects.
            is_full = (c * bps + s) < full_blocks

            @pl.when(is_full)
            def _():
                accumulate(False)

            @pl.when(jnp.logical_not(is_full))
            def _():
                accumulate(True)
        else:
            accumulate(False)

    return kernel


def mse_loss_pallas(pred, gt, *, tile_rows=8192, num_splits=None):
    """Equivalent of _MSE_loss(pred, gt): returns a scalar float32."""
    assert pred.shape == gt.shape, "pred/gt must have identical shapes"

    # Keep each input in its NATIVE dtype (no wrapper promote/upcast); the
    # kernel casts per-chunk in-register.  NOTE: gt == 1.0 stays exact in bf16.
    pred_f = jnp.ravel(pred)
    gt_f = jnp.ravel(gt)
    total = pred_f.shape[0]
    if total == 0:
        return jnp.zeros((), jnp.float32)

    # Pad only to a 128-lane boundary (needed for the (rows, 128) view);
    # zeros are neutral: (0-0)^2 == 0 and 0 != 1.  Alignment beyond that is
    # handled by in-kernel masking, so no full-array pad copy for the common
    # 128-aligned case and no rounding to tile_rows multiples.
    if total % LANES:
        pad = LANES - total % LANES
        pred_f = jnp.pad(pred_f, (0, pad))
        gt_f = jnp.pad(gt_f, (0, pad))
    rows = (total + LANES - 1) // LANES

    # Tile rows: multiple of ACC_ROWS (covers f32/bf16/int8 sublane packing),
    # no bigger than the (rounded) row count.
    tile_rows = max(ACC_ROWS, (int(tile_rows) // ACC_ROWS) * ACC_ROWS)
    rows_rounded = ((rows + ACC_ROWS - 1) // ACC_ROWS) * ACC_ROWS
    tile_rows = min(tile_rows, rows_rounded)

    num_blocks = pl.cdiv(rows, tile_rows)
    if num_splits is None:
        num_splits = _default_num_splits()
    num_splits = max(1, min(int(num_splits), num_blocks))
    bps = pl.cdiv(num_blocks, num_splits)

    pred_2d = pred_f.reshape(rows, LANES)
    gt_2d = gt_f.reshape(rows, LANES)

    # Clamp the block index so out-of-range (overflow) grid points re-read a
    # valid block; their contribution is fully masked in-kernel.
    def in_idx(c, s):
        return (jnp.minimum(c * bps + s, num_blocks - 1), 0)

    def out_idx(c, s):
        return (c, 0, 0)

    kernel = _make_kernel(rows=rows, tile_rows=tile_rows, bps=bps,
                          num_splits=num_splits)

    sse_part, pos_part = pl.pallas_call(
        kernel,
        out_shape=(
            jax.ShapeDtypeStruct((num_splits, ACC_ROWS, LANES), jnp.float32),
            jax.ShapeDtypeStruct((num_splits, ACC_ROWS, LANES), jnp.float32),
        ),
        grid_spec=pltpu.PrefetchScalarGridSpec(
            num_scalar_prefetch=0,
            grid=(num_splits, bps),
            in_specs=[
                pl.BlockSpec((tile_rows, LANES), in_idx),
                pl.BlockSpec((tile_rows, LANES), in_idx),
            ],
            out_specs=(
                pl.BlockSpec((1, ACC_ROWS, LANES), out_idx),
                pl.BlockSpec((1, ACC_ROWS, LANES), out_idx),
            ),
        ),
        compiler_params=pltpu.CompilerParams(
            dimension_semantics=("parallel", "arbitrary"),
            # 2 inputs x 2 buffers x (tile_rows x 128 x 4B) = 16 MiB at the
            # f32 default tile; leave headroom but stay under v7x's 64 MiB.
            vmem_limit_bytes=48 * 1024 * 1024,
        ),
    )(pred_2d, gt_2d)

    # Tiny final combine + PyTorch semantics (divide only if num_pos > 0).
    sse = jnp.sum(sse_part)
    npos = jnp.sum(pos_part)
    return jnp.where(npos > 0.0, sse / npos, sse)


def _mse_loss_ref(pred, gt):
    """Pure-JAX reference mirroring the PyTorch _MSE_loss."""
    pred = pred.astype(jnp.float32)
    gt = gt.astype(jnp.float32)
    num_pos = jnp.sum((gt == 1.0).astype(jnp.float32))
    sse = jnp.sum((pred - gt) ** 2)
    return jnp.where(num_pos > 0.0, sse / num_pos, sse)


if __name__ == "__main__":
    key = jax.random.PRNGKey(0)
    k1, k2, k3 = jax.random.split(key, 3)

    # 1) Heatmap-style inputs: pred in (0,1), gt mostly in (0,1) with exact 1s.
    shape = (2, 4, 16, 16)  # NCHW
    pred = jax.nn.sigmoid(jax.random.normal(k1, shape, dtype=jnp.float32))
    gt = jax.random.uniform(k2, shape, dtype=jnp.float32)
    pos_mask = jax.random.uniform(k3, shape) < 0.05
    gt = jnp.where(pos_mask, 1.0, gt)

    loss = jax.block_until_ready(mse_loss_pallas(pred, gt))
    ref = jax.block_until_ready(_mse_loss_ref(pred, gt))
    assert jnp.allclose(loss, ref, rtol=1e-5, atol=1e-5), (loss, ref)

    # 2) bf16, non-128-aligned total (tail masking path, native-dtype stream).
    shape2 = (2, 4, 17, 19)
    pred2 = jax.nn.sigmoid(jax.random.normal(k1, shape2)).astype(jnp.bfloat16)
    gt2 = jax.random.uniform(k2, shape2).astype(jnp.bfloat16)
    gt2 = jnp.where(jax.random.uniform(k3, shape2) < 0.05,
                    jnp.bfloat16(1.0), gt2)
    loss2 = jax.block_until_ready(mse_loss_pallas(pred2, gt2))
    ref2 = jax.block_until_ready(_mse_loss_ref(pred2, gt2))
    assert jnp.allclose(loss2, ref2, rtol=2e-2, atol=2e-2), (loss2, ref2)

    # 3) Multi-block + forced two-way split (exercises the v7x-style parallel
    #    grid, the overflow-block clamp, and the partial-tail mask; correct on
    #    single-TC chips too, just sequential).
    shape3 = (2, 4, 40, 52)
    pred3 = jax.nn.sigmoid(jax.random.normal(k1, shape3, dtype=jnp.float32))
    gt3 = jax.random.uniform(k2, shape3, dtype=jnp.float32)
    gt3 = jnp.where(jax.random.uniform(k3, shape3) < 0.05, 1.0, gt3)
    loss3 = jax.block_until_ready(
        mse_loss_pallas(pred3, gt3, tile_rows=64, num_splits=2))
    ref3 = jax.block_until_ready(_mse_loss_ref(pred3, gt3))
    assert jnp.allclose(loss3, ref3, rtol=1e-5, atol=1e-5), (loss3, ref3)

    print("KERNEL_OK")
</pallas_src>

<mosaic_0001>
module attributes {stable_mosaic.version = 11 : i64} {
  func.func @kernel(%arg0: i32, %arg1: i32, %arg2: memref<64x128xf32, #tpu.memory_space<vmem>>, %arg3: memref<64x128xf32, #tpu.memory_space<vmem>>, %arg4: memref<1x64x128xf32, #tpu.memory_space<vmem>>, %arg5: memref<1x64x128xf32, #tpu.memory_space<vmem>>) attributes {dimension_semantics = [#tpu.dimension_semantics<parallel>, #tpu.dimension_semantics<arbitrary>], iteration_bounds = array<i64: 1, 1>, scalar_prefetch = 0 : i64, scratch_operands = 0 : i64, tpu.core_type = #tpu.core_type<tc>, window_params = [{transform_indices = @transform_0, window_bounds = array<i64: 64, 128>}, {transform_indices = @transform_1, window_bounds = array<i64: 64, 128>}, {transform_indices = @transform_2, window_bounds = array<i64: 1, 64, 128>}, {transform_indices = @transform_3, window_bounds = array<i64: 1, 64, 128>}]} {
    %c0_i32 = arith.constant 0 : i32
    %0 = arith.cmpi eq, %arg1, %c0_i32 : i32
    %1 = arith.extui %0 : i1 to i32
    %c0_i32_0 = arith.constant 0 : i32
    %2 = arith.cmpi ne, %1, %c0_i32_0 : i32
    scf.if %2 {
      %cst = arith.constant 0.000000e+00 : f32
      %11 = vector.broadcast %cst : f32 to vector<1x64x128xf32>
      %c0 = arith.constant 0 : index
      %c0_4 = arith.constant 0 : index
      %c0_5 = arith.constant 0 : index
      %12 = vector.load %arg4[%c0, %c0_4, %c0_5] : memref<1x64x128xf32, #tpu.memory_space<vmem>>, vector<1x64x128xf32>
      tpu.vector_store %arg4[%c0, %c0_4, %c0_5], %11 {strides = array<i32>} : memref<1x64x128xf32, #tpu.memory_space<vmem>>, vector<1x64x128xf32>,
      %cst_6 = arith.constant 0.000000e+00 : f32
      %13 = vector.broadcast %cst_6 : f32 to vector<1x64x128xf32>
      %c0_7 = arith.constant 0 : index
      %c0_8 = arith.constant 0 : index
      %c0_9 = arith.constant 0 : index
      %14 = vector.load %arg5[%c0_7, %c0_8, %c0_9] : memref<1x64x128xf32, #tpu.memory_space<vmem>>, vector<1x64x128xf32>
      tpu.vector_store %arg5[%c0_7, %c0_8, %c0_9], %13 {strides = array<i32>} : memref<1x64x128xf32, #tpu.memory_space<vmem>>, vector<1x64x128xf32>,
    } else {
    }
    %c1_i32 = arith.constant 1 : i32
    %3 = arith.muli %arg0, %c1_i32 : i32
    %4 = arith.addi %3, %arg1 : i32
    %c0_i32_1 = arith.constant 0 : i32
    %5 = arith.cmpi slt, %4, %c0_i32_1 : i32
    %6 = arith.extui %5 : i1 to i32
    %c0_i32_2 = arith.constant 0 : i32
    %7 = arith.cmpi ne, %6, %c0_i32_2 : i32
    scf.if %7 {
      %cst = arith.constant 0.000000e+00 : f32
      %11 = vector.broadcast %cst : f32 to vector<64x128xf32>
      %cst_4 = arith.constant 0.000000e+00 : f32
      %12 = vector.broadcast %cst_4 : f32 to vector<64x128xf32>
      %c0_i32_5 = arith.constant 0 : i32
      %c64_i32 = arith.constant 64 : i32
      %13 = arith.muli %c0_i32_5, %c64_i32 : i32
      %14 = tpu.assume_multiple %13, 64 : i32
      %15 = arith.index_cast %14 : i32 to index
      %c0 = arith.constant 0 : index
      %16 = vector.load %arg2[%15, %c0] : memref<64x128xf32, #tpu.memory_space<vmem>>, vector<64x128xf32>
      %17 = arith.index_cast %14 : i32 to index
      %c0_6 = arith.constant 0 : index
      %18 = vector.load %arg3[%17, %c0_6] : memref<64x128xf32, #tpu.memory_space<vmem>>, vector<64x128xf32>
      %19 = arith.subf %16, %18 : vector<64x128xf32>
      %20 = arith.mulf %19, %19 : vector<64x128xf32>
      %cst_7 = arith.constant 1.000000e+00 : f32
      %21 = vector.broadcast %cst_7 : f32 to vector<64x128xf32>
      %22 = arith.cmpf oeq, %18, %21 : vector<64x128xf32>
      %23 = arith.extui %22 : vector<64x128xi1> to vector<64x128xi32>
      %24 = arith.sitofp %23 : vector<64x128xi32> to vector<64x128xf32>
      %25 = arith.addf %11, %20 : vector<64x128xf32>
      %26 = arith.addf %12, %24 : vector<64x128xf32>
      %c1_i32_8 = arith.constant 1 : i32
      %c0_9 = arith.constant 0 : index
      %c0_10 = arith.constant 0 : index
      %c0_11 = arith.constant 0 : index
      %27 = vector.load %arg4[%c0_9, %c0_10, %c0_11] : memref<1x64x128xf32, #tpu.memory_space<vmem>>, vector<1x64x128xf32>
      %28 = vector.shape_cast %27 : vector<1x64x128xf32> to vector<64x128xf32>
      %29 = arith.addf %28, %25 : vector<64x128xf32>
      %c0_12 = arith.constant 0 : index
      %c0_13 = arith.constant 0 : index
      %c0_14 = arith.constant 0 : index
      %30 = vector.load %arg4[%c0_12, %c0_13, %c0_14] : memref<1x64x128xf32, #tpu.memory_space<vmem>>, vector<1x64x128xf32>
      %31 = vector.shape_cast %30 : vector<1x64x128xf32> to vector<64x128xf32>
      %32 = vector.shape_cast %29 : vector<64x128xf32> to vector<1x64x128xf32>
      tpu.vector_store %arg4[%c0_12, %c0_13, %c0_14], %32 {strides = array<i32>} : memref<1x64x128xf32, #tpu.memory_space<vmem>>, vector<1x64x128xf32>,
      %c0_15 = arith.constant 0 : index
      %c0_16 = arith.constant 0 : index
      %c0_17 = arith.constant 0 : index
      %33 = vector.load %arg5[%c0_15, %c0_16, %c0_17] : memref<1x64x128xf32, #tpu.memory_space<vmem>>, vector<1x64x128xf32>
      %34 = vector.shape_cast %33 : vector<1x64x128xf32> to vector<64x128xf32>
      %35 = arith.addf %34, %26 : vector<64x128xf32>
      %c0_18 = arith.constant 0 : index
      %c0_19 = arith.constant 0 : index
      %c0_20 = arith.constant 0 : index
      %36 = vector.load %arg5[%c0_18, %c0_19, %c0_20] : memref<1x64x128xf32, #tpu.memory_space<vmem>>, vector<1x64x128xf32>
      %37 = vector.shape_cast %36 : vector<1x64x128xf32> to vector<64x128xf32>
      %38 = vector.shape_cast %35 : vector<64x128xf32> to vector<1x64x128xf32>
      tpu.vector_store %arg5[%c0_18, %c0_19, %c0_20], %38 {strides = array<i32>} : memref<1x64x128xf32, #tpu.memory_space<vmem>>, vector<1x64x128xf32>,
    } else {
    }
    %true = arith.constant true
    %8 = arith.xori %5, %true : i1
    %9 = arith.extui %8 : i1 to i32
    %c0_i32_3 = arith.constant 0 : i32
    %10 = arith.cmpi ne, %9, %c0_i32_3 : i32
    scf.if %10 {
      %c1_i32_4 = arith.constant 1 : i32
      %11 = arith.muli %arg0, %c1_i32_4 : i32
      %12 = arith.addi %11, %arg1 : i32
      %c64_i32 = arith.constant 64 : i32
      %13 = arith.muli %12, %c64_i32 : i32
      %c16_i32 = arith.constant 16 : i32
      %14 = arith.subi %c16_i32, %13 : i32
      %15 = tpu.iota {dimensions = array<i32: 0>} : vector<64x128xi32>
      %cst = arith.constant 0.000000e+00 : f32
      %16 = vector.broadcast %cst : f32 to vector<64x128xf32>
      %cst_5 = arith.constant 0.000000e+00 : f32
      %17 = vector.broadcast %cst_5 : f32 to vector<64x128xf32>
      %c0_i32_6 = arith.constant 0 : i32
      %c64_i32_7 = arith.constant 64 : i32
      %18 = arith.muli %c0_i32_6, %c64_i32_7 : i32
      %19 = tpu.assume_multiple %18, 64 : i32
      %20 = arith.index_cast %19 : i32 to index
      %c0 = arith.constant 0 : index
      %21 = vector.load %arg2[%20, %c0] : memref<64x128xf32, #tpu.memory_space<vmem>>, vector<64x128xf32>
      %22 = arith.index_cast %19 : i32 to index
      %c0_8 = arith.constant 0 : index
      %23 = vector.load %arg3[%22, %c0_8] : memref<64x128xf32, #tpu.memory_space<vmem>>, vector<64x128xf32>
      %24 = arith.subf %21, %23 : vector<64x128xf32>
      %25 = arith.mulf %24, %24 : vector<64x128xf32>
      %cst_9 = arith.constant 1.000000e+00 : f32
      %26 = vector.broadcast %cst_9 : f32 to vector<64x128xf32>
      %27 = arith.cmpf oeq, %23, %26 : vector<64x128xf32>
      %28 = arith.extui %27 : vector<64x128xi1> to vector<64x128xi32>
      %29 = arith.sitofp %28 : vector<64x128xi32> to vector<64x128xf32>
      %c64_i32_10 = arith.constant 64 : i32
      %30 = arith.muli %c0_i32_6, %c64_i32_10 : i32
      %31 = arith.subi %14, %30 : i32
      %32 = vector.broadcast %31 : i32 to vector<64x128xi32>
      %33 = arith.cmpi slt, %15, %32 : vector<64x128xi32>
      %cst_11 = arith.constant 0.000000e+00 : f32
      %34 = vector.broadcast %cst_11 : f32 to vector<64x128xf32>
      %35 = arith.select %33, %25, %34 : vector<64x128xi1>, vector<64x128xf32>
      %cst_12 = arith.constant 0.000000e+00 : f32
      %36 = vector.broadcast %cst_12 : f32 to vector<64x128xf32>
      %37 = arith.select %33, %29, %36 : vector<64x128xi1>, vector<64x128xf32>
      %38 = arith.addf %16, %35 : vector<64x128xf32>
      %39 = arith.addf %17, %37 : vector<64x128xf32>
      %c1_i32_13 = arith.constant 1 : i32
      %c0_14 = arith.constant 0 : index
      %c0_15 = arith.constant 0 : index
      %c0_16 = arith.constant 0 : index
      %40 = vector.load %arg4[%c0_14, %c0_15, %c0_16] : memref<1x64x128xf32, #tpu.memory_space<vmem>>, vector<1x64x128xf32>
      %41 = vector.shape_cast %40 : vector<1x64x128xf32> to vector<64x128xf32>
      %42 = arith.addf %41, %38 : vector<64x128xf32>
      %c0_17 = arith.constant 0 : index
      %c0_18 = arith.constant 0 : index
      %c0_19 = arith.constant 0 : index
      %43 = vector.load %arg4[%c0_17, %c0_18, %c0_19] : memref<1x64x128xf32, #tpu.memory_space<vmem>>, vector<1x64x128xf32>
      %44 = vector.shape_cast %43 : vector<1x64x128xf32> to vector<64x128xf32>
      %45 = vector.shape_cast %42 : vector<64x128xf32> to vector<1x64x128xf32>
      tpu.vector_store %arg4[%c0_17, %c0_18, %c0_19], %45 {strides = array<i32>} : memref<1x64x128xf32, #tpu.memory_space<vmem>>, vector<1x64x128xf32>,
      %c0_20 = arith.constant 0 : index
      %c0_21 = arith.constant 0 : index
      %c0_22 = arith.constant 0 : index
      %46 = vector.load %arg5[%c0_20, %c0_21, %c0_22] : memref<1x64x128xf32, #tpu.memory_space<vmem>>, vector<1x64x128xf32>
      %47 = vector.shape_cast %46 : vector<1x64x128xf32> to vector<64x128xf32>
      %48 = arith.addf %47, %39 : vector<64x128xf32>
      %c0_23 = arith.constant 0 : index
      %c0_24 = arith.constant 0 : index
      %c0_25 = arith.constant 0 : index
      %49 = vector.load %arg5[%c0_23, %c0_24, %c0_25] : memref<1x64x128xf32, #tpu.memory_space<vmem>>, vector<1x64x128xf32>
      %50 = vector.shape_cast %49 : vector<1x64x128xf32> to vector<64x128xf32>
      %51 = vector.shape_cast %48 : vector<64x128xf32> to vector<1x64x128xf32>
      tpu.vector_store %arg5[%c0_23, %c0_24, %c0_25], %51 {strides = array<i32>} : memref<1x64x128xf32, #tpu.memory_space<vmem>>, vector<1x64x128xf32>,
    } else {
    }
    return
  }
  func.func @transform_0(%arg0: i32, %arg1: i32) -> (i32, i32) {
    %c1_i32 = arith.constant 1 : i32
    %0 = arith.muli %arg0, %c1_i32 : i32
    %1 = arith.addi %0, %arg1 : i32
    %c0_i32 = arith.constant 0 : i32
    %2 = arith.minsi %1, %c0_i32 : i32
    %c0_i32_0 = arith.constant 0 : i32
    %c0_i32_1 = arith.constant 0 : i32
    return %2, %c0_i32_0 : i32, i32
  }
  func.func @transform_1(%arg0: i32, %arg1: i32) -> (i32, i32) {
    %c1_i32 = arith.constant 1 : i32
    %0 = arith.muli %arg0, %c1_i32 : i32
    %1 = arith.addi %0, %arg1 : i32
    %c0_i32 = arith.constant 0 : i32
    %2 = arith.minsi %1, %c0_i32 : i32
    %c0_i32_0 = arith.constant 0 : i32
    %c0_i32_1 = arith.constant 0 : i32
    return %2, %c0_i32_0 : i32, i32
  }
  func.func @transform_2(%arg0: i32, %arg1: i32) -> (i32, i32, i32) {
    %c0_i32 = arith.constant 0 : i32
    %c0_i32_0 = arith.constant 0 : i32
    %c0_i32_1 = arith.constant 0 : i32
    return %arg0, %c0_i32, %c0_i32_0 : i32, i32, i32
  }
  func.func @transform_3(%arg0: i32, %arg1: i32) -> (i32, i32, i32) {
    %c0_i32 = arith.constant 0 : i32
    %c0_i32_0 = arith.constant 0 : i32
    %c0_i32_1 = arith.constant 0 : i32
    return %arg0, %c0_i32, %c0_i32_0 : i32, i32, i32
  }
}

</mosaic_0001>

<bundles_post_ra>
// kernel: tpu_custom_call.1
= control target key start
LH: loop header
LB: loop body
LE: loop exit
PB: predicated region body
PF: predicated region fallthrough
CT: control target
= control target key end

     0   :  { %9 = vsyncpa [#allocation3], 0  ;;  %s631_s0 = inlined_call_operand.hbm [shape: f32[16,128], index: 0, kind: input, shape index: {}]   ;;  %s632_s1 = inlined_call_operand.hbm [shape: f32[16,128], index: 1, kind: input, shape index: {}]   ;;  %s633_s2 = inlined_call_operand.hbm [shape: f32[1,64,128], index: 2, kind: output, shape index: {0}]   ;;  %s634_s3 = inlined_call_operand.hbm [shape: f32[1,64,128], index: 3, kind: output, shape index: {1}]  }
   0x1   :  { %10 = vsyncpa [#allocation6], 0 }
   0x2   :  { %11 = vsyncpa [#allocation4], 0 }
   0x3   :  { %12 = vsyncpa [#allocation9], 0 }
   0x4   :  { %23 = vsyncadd [#allocation3], 768  ;;  %s537_s12 = smov [#allocation2]   ;;  %s441_s16 = scalar_lea.hbm %s631_s0, 256 }
   0x5   :  { %s28_s13 = sshll.u32 %s537_s12, 4  ;;  %p442_p0 = scmp.ne.s32.totalorder %s631_s0, %s441_s16  ;;  %s29_s13 = int_to_ptr.vmem [resolvable:$true] %s28_s13 }
   0x6   :  { %p445_p1 = scmp.lt.u32.totalorder %s441_s16, %s631_s0 }
   0x8   :  { %p447_p2 = pnand %p445_p1, %p442_p0 }
   0xa   :  { %450 = shalt.err (!%p447_p2)
}
   0xb   :  { %s451_s21 = scalar_lea.vmem %s29_s13, 256  ;;  %s455_s22 = scalar_lea.vmem %s29_s13, 1024 }
   0xc   :  { %p452_p3 = scmp.ne.s32.totalorder %s29_s13, %s451_s21  ;;  %p456_p4 = scmp.lt.s32.totalorder %s29_s13, %s29_s13 }
   0xd   :  { %p457_p5 = scmp.lt.s32.totalorder %s455_s22, %s451_s21 }
   0xf   :  { %p458_p6 = por %p457_p5, %p456_p4 }
  0x11   :  { %p459_p7 = pnand %p458_p6, %p452_p3 }
  0x13   :  { %462 = shalt.err (!%p459_p7)
}
  0x14   :  { %s538_s23 = smov 128   ;;  %s539_s24 = smov 8  }
  0x15   :  { %34 = dma.hbm_to_vmem [thread:$0]  %s631_s0, 256, %s29_s13, [#allocation3], %s538_s23, %s538_s23, %s539_s24  }
  0x16   :  { %45 = vsyncadd [#allocation6], 768  ;;  %s540_s27 = smov [#allocation5]   ;;  %s463_s4 = scalar_lea.hbm %s632_s1, 256 }
  0x17   :  { %s50_s28 = sshll.u32 %s540_s27, 4  ;;  %p464_p8 = scmp.ne.s32.totalorder %s632_s1, %s463_s4  ;;  %s51_s28 = int_to_ptr.vmem [resolvable:$true] %s50_s28 }
  0x18   :  { %p467_p9 = scmp.lt.u32.totalorder %s463_s4, %s632_s1 }
  0x1a   :  { %p469_p10 = pnand %p467_p9, %p464_p8 }
  0x1c   :  { %472 = shalt.err (!%p469_p10)
}
  0x1d   :  { %s473_s9 = scalar_lea.vmem %s51_s28, 256  ;;  %s477_s0 = scalar_lea.vmem %s51_s28, 1024 }
  0x1e   :  { %p474_p11 = scmp.ne.s32.totalorder %s51_s28, %s473_s9  ;;  %p478_p12 = scmp.lt.s32.totalorder %s51_s28, %s51_s28 }
  0x1f   :  { %p479_p13 = scmp.lt.s32.totalorder %s477_s0, %s473_s9 }
  0x21   :  { %p480_p0 = por %p479_p13, %p478_p12 }
  0x23   :  { %p481_p1 = pnand %p480_p0, %p474_p11 }
  0x25   :  { %484 = shalt.err (!%p481_p1)
}
  0x26   :  { %56 = dma.hbm_to_vmem [thread:$0]  %s632_s1, 256, %s51_s28, [#allocation6], %s538_s23, %s538_s23, %s539_s24  }
  0x27   :  { %529 = dma.done.wait [#allocation3], 1024  }
  0x28   :  { %530 = vsyncadd [#allocation3], 4294966272 }
  0x29   :  { %531 = dma.done.wait [#allocation6], 1024  }
  0x2a   :  { %532 = vsyncadd [#allocation6], 4294966272  ;;  %v541_v0 = vmov 0.0   ;;  %v235_v1 = vld [vmem:[#allocation2] sm:$0xff]  ;;  %v236_v3 = vld [vmem:[#allocation2 + $0x8] sm:$0xff]  ;;  %s542_s1 = smov [#allocation8]  }
  0x2b   :  { %350 = vst [vmem:[#allocation7 + $0x10] sm:$0xff] %v541_v0  ;;  %351 = vst [vmem:[#allocation7 + $0x18] sm:$0xff] %v541_v0  ;;  %v243_v2 = vld [vmem:[#allocation5] sm:$0xff]  ;;  %v244_v5 = vld [vmem:[#allocation5 + $0x8] sm:$0xff]  ;;  %s397_s12 = sshll.u32 %s542_s1, 4  ;;  %s543_s13 = smov [#allocation7]   ;;  %s398_s12 = int_to_ptr.vmem [resolvable:$true] %s397_s12 }
  0x2c   :  { %352 = vst [vmem:[#allocation7 + $0x20] sm:$0xff] %v541_v0  ;;  %353 = vst [vmem:[#allocation7 + $0x28] sm:$0xff] %v541_v0  ;;  %v251_v4 = vsub.f32 %v235_v1, %v243_v2  ;;  %vm267_vm0 = vcmp.eq.f32.partialorder %v243_v2, 1.0  ;;  %v252_v6 = vsub.f32 %v236_v3, %v244_v5  ;;  %vm268_vm1 = vcmp.eq.f32.partialorder %v244_v5, 1.0  ;;  %s385_s14 = sshll.u32 %s543_s13, 4  ;;  %s485_s15 = scalar_lea.vmem %s398_s12, 1024  ;;  %s594_s14 = int_to_ptr.vmem [resolvable:$true] %s385_s14 }
  0x2d   :  { %354 = vst [vmem:[#allocation7 + $0x30] sm:$0xff] %v541_v0  ;;  %355 = vst [vmem:[#allocation7 + $0x38] sm:$0xff] %v541_v0  ;;  %v426_v7 = vsel %vm267_vm0, 1.0, %v541_v0  ;;  %v427_v9 = vsel %vm268_vm1, 1.0, %v541_v0  ;;  %p486_p2 = scmp.ne.s32.totalorder %s398_s12, %s485_s15  ;;  %p490_p3 = scmp.lt.s32.totalorder %s398_s12, %s398_s12 }
  0x2e   :  { %374 = vst [vmem:[#allocation8 + $0x10] sm:$0xff] %v541_v0  ;;  %375 = vst [vmem:[#allocation8 + $0x18] sm:$0xff] %v541_v0  ;;  %v259_v8 = vmul.f32 %v251_v4, %v251_v4  ;;  %v260_v10 = vmul.f32 %v252_v6, %v252_v6  ;;  %p491_p4 = scmp.lt.s32.totalorder %s485_s15, %s485_s15 }
  0x2f   :  { %376 = vst [vmem:[#allocation8 + $0x20] sm:$0xff] %v541_v0  ;;  %377 = vst [vmem:[#allocation8 + $0x28] sm:$0xff] %v541_v0 }
  0x30   :  { %378 = vst [vmem:[#allocation8 + $0x30] sm:$0xff] %v541_v0  ;;  %379 = vst [vmem:[#allocation8 + $0x38] sm:$0xff] %v541_v0  ;;  %p492_p5 = por %p491_p4, %p490_p3 }
  0x31   :  { %372 = vst [vmem:[#allocation8] sm:$0xff] %v426_v7  ;;  %373 = vst [vmem:[#allocation8 + $0x8] sm:$0xff] %v427_v9 }
  0x32   :  { %348 = vst [vmem:[#allocation7] sm:$0xff] %v259_v8  ;;  %p493_p6 = pnand %p492_p5, %p486_p2 }
  0x34   :  { %496 = shalt.err (!%p493_p6)
}
  0x35   :  { %s497_s18 = scalar_lea.hbm %s634_s3, 1024 }
  0x36   :  { %p498_p7 = scmp.ne.s32.totalorder %s634_s3, %s497_s18  ;;  %p501_p8 = scmp.lt.u32.totalorder %s497_s18, %s634_s3 }
  0x38   :  { %p503_p9 = pnand %p501_p8, %p498_p7 }
  0x3a   :  { %506 = shalt.err (!%p503_p9)
}
  0x3b   :  { %403 = dma.vmem_to_hbm [thread:$0]  %s398_s12, 1024, %s634_s3, [#allocation9], %s538_s23, %s538_s23, %s539_s24   ;;  %349 = vst [vmem:[#allocation7 + $0x8] sm:$0xff] %v260_v10 }
  0x3c   :  { %s507_s27 = scalar_lea.vmem %s594_s14, 1024  ;;  %p512_p11 = scmp.lt.s32.totalorder %s594_s14, %s594_s14 }
  0x3d   :  { %p508_p10 = scmp.ne.s32.totalorder %s594_s14, %s507_s27  ;;  %p513_p12 = scmp.lt.s32.totalorder %s507_s27, %s507_s27 }
  0x3f   :  { %p514_p13 = por %p513_p12, %p512_p11 }
  0x41   :  { %p515_p0 = pnand %p514_p13, %p508_p10 }
  0x43   :  { %518 = shalt.err (!%p515_p0)
}
  0x44   :  { %s519_s30 = scalar_lea.hbm %s633_s2, 1024 }
  0x45   :  { %p520_p1 = scmp.ne.s32.totalorder %s633_s2, %s519_s30  ;;  %p523_p2 = scmp.lt.u32.totalorder %s519_s30, %s633_s2 }
  0x47   :  { %p525_p3 = pnand %p523_p2, %p520_p1 }
  0x49   :  { %528 = shalt.err (!%p525_p3)
}
  0x4a   :  { %391 = dma.vmem_to_hbm [thread:$0]  %s594_s14, 1024, %s633_s2, [#allocation4], %s538_s23, %s538_s23, %s539_s24  }
  0x4b   :  { %533 = dma.done.wait [#allocation4], 1024  }
  0x4c   :  { %534 = vsyncadd [#allocation4], 4294966272 }
  0x4d   :  { %535 = dma.done.wait [#allocation9], 1024  }
  0x4e   :  { %536 = vsyncadd [#allocation9], 4294966272 }
  0x4f   :  { %410 = vsyncpa [#allocation3], 1 }
  0x50   :  { %411 = vsyncpa [#allocation6], 1 }
  0x51   :  { %412 = vsyncpa [#allocation4], 1 }
  0x52   :  { %413 = vsyncpa [#allocation9], 1 }

</bundles_post_ra>
